<compile_context>
chip_gen: v5e
topology: v5e:2x2
jax: 0.10.0
libtpu: 0.0.40
codegen_flags: <defaults>
</compile_context>

<pallas_src>
import math

import jax
import jax.numpy as jnp
from jax.experimental import pallas as pl
from jax.experimental.pallas import tpu as pltpu


def _gelu_tanh(x):
    # GELU(approximate='tanh'), computed in f32 inside the kernel.
    c = math.sqrt(2.0 / math.pi)
    return 0.5 * x * (1.0 + jnp.tanh(c * (x + 0.044715 * x * x * x)))


def _round_up(x, m):
    return (x + m - 1) // m * m


def _pick_hidden_tile(H, cap):
    """Largest divisor of H that is <= cap, preferring multiples of 128."""
    cap = max(1, min(cap, H))
    d = cap - cap % 128
    while d >= 128:
        if H % d == 0:
            return d
        d -= 128
    for d in range(cap, 0, -1):
        if H % d == 0:
            return d
    return H


def mlp_kernel(x_ref, wfc_ref, bfc_ref, wproj_ref, bproj_ref, o_ref, acc_ref):
    # Grid = (row tiles [parallel], hidden-dim tiles [arbitrary / reduction]).
    # x_ref:    (tm, C)          wfc_ref:  (C, th)   bfc_ref:  (1, th)
    # wproj_ref:(th, C)          bproj_ref:(1, C)
    # o_ref:    (tm, C)          acc_ref:  (tm, C) f32 scratch
    h_idx = pl.program_id(1)

    @pl.when(h_idx == 0)
    def _init():
        acc_ref[...] = jnp.zeros_like(acc_ref)

    # c_fc on this hidden slice (f32 accumulation on the MXU), bias + tanh-GELU
    # in f32 (VPU/EUP), then this slice's partial contribution to c_proj.
    h = jnp.dot(x_ref[...], wfc_ref[...], preferred_element_type=jnp.float32)
    h = _gelu_tanh(h + bfc_ref[...])
    acc_ref[...] += jnp.dot(h.astype(wproj_ref.dtype), wproj_ref[...],
                            preferred_element_type=jnp.float32)

    @pl.when(h_idx == pl.num_programs(1) - 1)
    def _finalize():
        # c_proj bias is added exactly once, only in the finalize step.
        o_ref[...] = (acc_ref[...] + bproj_ref[...]).astype(o_ref.dtype)


def mlp_pallas(x, w_fc, b_fc, w_proj, b_proj, *, tm=256, th=512,
               compute_dtype=None):
    """x: (B, T, C); w_fc: (C, H); b_fc: (H,)|(1,H); w_proj: (H, C); b_proj: (C,)|(1,C)."""
    B, T, C = x.shape
    Cw, H = w_fc.shape
    assert Cw == C and w_proj.shape == (H, C)

    out_dtype = x.dtype
    if compute_dtype is not None:
        # bf16 (or fp8) MXU inputs; accumulation stays f32 via
        # preferred_element_type inside the kernel.
        x = x.astype(compute_dtype)
        w_fc = w_fc.astype(compute_dtype)
        w_proj = w_proj.astype(compute_dtype)
    b_fc = b_fc.reshape(1, H).astype(jnp.float32)
    b_proj = b_proj.reshape(1, C).astype(jnp.float32)

    M = B * T
    x2d = x.reshape(M, C)

    # Row tile: MXU-sized by default, shrunk for tiny inputs, multiple of 8.
    tm = _round_up(min(tm, max(M, 8)), 8)
    M_pad = _round_up(M, tm)
    if M_pad != M:
        x2d = jnp.pad(x2d, ((0, M_pad - M), (0, 0)))

    # Hidden tile: only (C, th)/(th, C) weight slices are VMEM-resident.
    th = _pick_hidden_tile(H, th)

    grid = (M_pad // tm, H // th)

    x_bytes = x2d.dtype.itemsize
    w_bytes = w_fc.dtype.itemsize
    o_bytes = jnp.dtype(out_dtype).itemsize
    vmem_est = (
        2 * tm * C * x_bytes        # x tiles (double-buffered)
        + 2 * tm * C * o_bytes      # out tiles (double-buffered)
        + 2 * C * th * w_bytes      # w_fc slices (double-buffered)
        + 2 * th * C * w_bytes      # w_proj slices (double-buffered)
        + 2 * (th + C) * 4          # bias slices
        + tm * C * 4                # f32 accumulator scratch
        + tm * th * 4               # f32 intermediate activation
    )
    vmem_limit = int(min(max(2 * vmem_est, 32 * 1024 * 1024),
                         64 * 1024 * 1024))

    cost = pl.CostEstimate(
        flops=4 * M_pad * C * H,          # two matmuls, 2 flops / MAC each
        transcendentals=M_pad * H,        # tanh in GELU
        bytes_accessed=(2 * M_pad * C * x_bytes + 2 * C * H * w_bytes
                        + (H + C) * 4),
    )

    out2d = pl.pallas_call(
        mlp_kernel,
        out_shape=jax.ShapeDtypeStruct((M_pad, C), out_dtype),
        grid_spec=pltpu.PrefetchScalarGridSpec(
            num_scalar_prefetch=0,
            grid=grid,
            in_specs=[
                pl.BlockSpec((tm, C), lambda i, h: (i, 0)),   # x row tile
                pl.BlockSpec((C, th), lambda i, h: (0, h)),   # w_fc slice
                pl.BlockSpec((1, th), lambda i, h: (0, h)),   # b_fc slice
                pl.BlockSpec((th, C), lambda i, h: (h, 0)),   # w_proj slice
                pl.BlockSpec((1, C), lambda i, h: (0, 0)),    # b_proj
            ],
            out_specs=pl.BlockSpec((tm, C), lambda i, h: (i, 0)),
            scratch_shapes=[pltpu.VMEM((tm, C), jnp.float32)],
        ),
        compiler_params=pltpu.CompilerParams(
            dimension_semantics=("parallel", "arbitrary"),
            vmem_limit_bytes=vmem_limit,
        ),
        cost_estimate=cost,
    )(x2d, w_fc, b_fc, w_proj, b_proj)

    return out2d[:M].reshape(B, T, C)


def mlp_reference(x, w_fc, b_fc, w_proj, b_proj):
    h = jnp.einsum("btc,ch->bth", x, w_fc) + b_fc.reshape(-1)
    h = _gelu_tanh(h)
    return jnp.einsum("bth,hc->btc", h, w_proj) + b_proj.reshape(-1)


if __name__ == "__main__":
    key = jax.random.PRNGKey(0)

    def make_inputs(k, B, T, C, H):
        kx, kw1, kb1, kw2, kb2 = jax.random.split(k, 5)
        x = jax.random.normal(kx, (B, T, C), dtype=jnp.float32)
        w_fc = jax.random.normal(kw1, (C, H), jnp.float32) * (1.0 / math.sqrt(C))
        b_fc = jax.random.normal(kb1, (H,), jnp.float32) * 0.01
        w_proj = jax.random.normal(kw2, (H, C), jnp.float32) * (1.0 / math.sqrt(H))
        b_proj = jax.random.normal(kb2, (C,), jnp.float32) * 0.01
        return x, w_fc, b_fc, w_proj, b_proj

    k1, k2 = jax.random.split(key)

    # 1) Small config consistent with the module: n_embd=32, hidden=128.
    args = make_inputs(k1, B=2, T=8, C=32, H=128)
    y = mlp_pallas(*args)
    jax.block_until_ready(y)
    y_ref = mlp_reference(*args)
    assert y.shape == (2, 8, 32)
    assert jnp.allclose(y, y_ref, atol=1e-4, rtol=1e-4)

    # 2) Slightly larger config exercising the multi-step grid: 4 row tiles
    #    (parallel) x 4 hidden tiles (reduction with accumulator).
    args2 = make_inputs(k2, B=2, T=64, C=128, H=512)
    y2 = mlp_pallas(*args2, tm=32, th=128)
    jax.block_until_ready(y2)
    y2_ref = mlp_reference(*args2)
    assert y2.shape == (2, 64, 128)
    assert jnp.allclose(y2, y2_ref, atol=1e-2, rtol=1e-2)

    # 3) bf16 MXU-input path (f32 accumulation) — looser tolerance.
    y2_bf16 = mlp_pallas(*args2, tm=32, th=128, compute_dtype=jnp.bfloat16)
    jax.block_until_ready(y2_bf16)
    assert jnp.allclose(y2_bf16, y2_ref, atol=2e-1, rtol=2e-1)

    print("KERNEL_OK")
</pallas_src>

<mosaic_0001>
module attributes {stable_mosaic.version = 11 : i64} {
  func.func @mlp_kernel(%arg0: i32, %arg1: i32, %arg2: memref<16x32xf32, #tpu.memory_space<vmem>>, %arg3: memref<32x128xf32, #tpu.memory_space<vmem>>, %arg4: memref<1x128xf32, #tpu.memory_space<vmem>>, %arg5: memref<128x32xf32, #tpu.memory_space<vmem>>, %arg6: memref<1x32xf32, #tpu.memory_space<vmem>>, %arg7: memref<16x32xf32, #tpu.memory_space<vmem>>, %arg8: memref<16x32xf32, #tpu.memory_space<vmem>>) attributes {dimension_semantics = [#tpu.dimension_semantics<parallel>, #tpu.dimension_semantics<arbitrary>], iteration_bounds = array<i64: 1, 1>, scalar_prefetch = 0 : i64, scratch_operands = 1 : i64, tpu.core_type = #tpu.core_type<tc>, window_params = [{transform_indices = @transform_0, window_bounds = array<i64: 16, 32>}, {transform_indices = @transform_1, window_bounds = array<i64: 32, 128>}, {transform_indices = @transform_2, window_bounds = array<i64: 1, 128>}, {transform_indices = @transform_3, window_bounds = array<i64: 128, 32>}, {pipeline_mode = #tpu.pipeline_mode<synchronous>, transform_indices = @transform_4, window_bounds = array<i64: 1, 32>}, {transform_indices = @transform_5, window_bounds = array<i64: 16, 32>}]} {
    %c0_i32 = arith.constant 0 : i32
    %0 = arith.cmpi eq, %arg1, %c0_i32 : i32
    %1 = arith.extui %0 : i1 to i32
    %c0_i32_0 = arith.constant 0 : i32
    %2 = arith.cmpi ne, %1, %c0_i32_0 : i32
    scf.if %2 {
      %cst_19 = arith.constant 0.000000e+00 : f32
      %30 = vector.broadcast %cst_19 : f32 to vector<16x32xf32>
      %c0_20 = arith.constant 0 : index
      %c0_21 = arith.constant 0 : index
      %31 = vector.load %arg8[%c0_20, %c0_21] : memref<16x32xf32, #tpu.memory_space<vmem>>, vector<16x32xf32>
      tpu.vector_store %arg8[%c0_20, %c0_21], %30 {strides = array<i32>} : memref<16x32xf32, #tpu.memory_space<vmem>>, vector<16x32xf32>,
    } else {
    }
    %c0 = arith.constant 0 : index
    %c0_1 = arith.constant 0 : index
    %3 = vector.load %arg2[%c0, %c0_1] : memref<16x32xf32, #tpu.memory_space<vmem>>, vector<16x32xf32>
    %c0_2 = arith.constant 0 : index
    %c0_3 = arith.constant 0 : index
    %4 = vector.load %arg3[%c0_2, %c0_3] : memref<32x128xf32, #tpu.memory_space<vmem>>, vector<32x128xf32>
    %cst = arith.constant dense<0.000000e+00> : vector<16x128xf32>
    %5 = tpu.matmul %3, %4, %cst {dimension_numbers = #tpu.dot_dimension_numbers<[1], [0], [0], [1], [0, 0, 1, 1], [], []>} : vector<16x32xf32>, vector<32x128xf32>, vector<16x128xf32> -> vector<16x128xf32>
    %c0_4 = arith.constant 0 : index
    %c0_5 = arith.constant 0 : index
    %6 = vector.load %arg4[%c0_4, %c0_5] : memref<1x128xf32, #tpu.memory_space<vmem>>, vector<1x128xf32>
    %7 = vector.broadcast %6 : vector<1x128xf32> to vector<16x128xf32>
    %8 = arith.addf %5, %7 : vector<16x128xf32>
    %cst_6 = arith.constant 5.000000e-01 : f32
    %9 = vector.broadcast %cst_6 : f32 to vector<16x128xf32>
    %10 = arith.mulf %9, %8 : vector<16x128xf32>
    %cst_7 = arith.constant 4.471500e-02 : f32
    %11 = vector.broadcast %cst_7 : f32 to vector<16x128xf32>
    %12 = arith.mulf %11, %8 : vector<16x128xf32>
    %13 = arith.mulf %12, %8 : vector<16x128xf32>
    %14 = arith.mulf %13, %8 : vector<16x128xf32>
    %15 = arith.addf %8, %14 : vector<16x128xf32>
    %cst_8 = arith.constant 0.797884583 : f32
    %16 = vector.broadcast %cst_8 : f32 to vector<16x128xf32>
    %17 = arith.mulf %16, %15 : vector<16x128xf32>
    %18 = math.tanh %17 : vector<16x128xf32>
    %cst_9 = arith.constant 1.000000e+00 : f32
    %19 = vector.broadcast %cst_9 : f32 to vector<16x128xf32>
    %20 = arith.addf %19, %18 : vector<16x128xf32>
    %21 = arith.mulf %10, %20 : vector<16x128xf32>
    %c0_10 = arith.constant 0 : index
    %c0_11 = arith.constant 0 : index
    %22 = vector.load %arg8[%c0_10, %c0_11] : memref<16x32xf32, #tpu.memory_space<vmem>>, vector<16x32xf32>
    %c0_12 = arith.constant 0 : index
    %c0_13 = arith.constant 0 : index
    %23 = vector.load %arg5[%c0_12, %c0_13] : memref<128x32xf32, #tpu.memory_space<vmem>>, vector<128x32xf32>
    %cst_14 = arith.constant dense<0.000000e+00> : vector<16x32xf32>
    %24 = tpu.matmul %21, %23, %cst_14 {dimension_numbers = #tpu.dot_dimension_numbers<[1], [0], [0], [1], [0, 0, 1, 1], [], []>} : vector<16x128xf32>, vector<128x32xf32>, vector<16x32xf32> -> vector<16x32xf32>
    %25 = arith.addf %22, %24 : vector<16x32xf32>
    %c0_15 = arith.constant 0 : index
    %c0_16 = arith.constant 0 : index
    %26 = vector.load %arg8[%c0_15, %c0_16] : memref<16x32xf32, #tpu.memory_space<vmem>>, vector<16x32xf32>
    tpu.vector_store %arg8[%c0_15, %c0_16], %25 {strides = array<i32>} : memref<16x32xf32, #tpu.memory_space<vmem>>, vector<16x32xf32>,
    %c0_i32_17 = arith.constant 0 : i32
    %27 = arith.cmpi eq, %arg1, %c0_i32_17 : i32
    %28 = arith.extui %27 : i1 to i32
    %c0_i32_18 = arith.constant 0 : i32
    %29 = arith.cmpi ne, %28, %c0_i32_18 : i32
    scf.if %29 {
      %c0_19 = arith.constant 0 : index
      %c0_20 = arith.constant 0 : index
      %30 = vector.load %arg8[%c0_19, %c0_20] : memref<16x32xf32, #tpu.memory_space<vmem>>, vector<16x32xf32>
      %c0_21 = arith.constant 0 : index
      %c0_22 = arith.constant 0 : index
      %31 = vector.load %arg6[%c0_21, %c0_22] : memref<1x32xf32, #tpu.memory_space<vmem>>, vector<1x32xf32>
      %32 = vector.broadcast %31 : vector<1x32xf32> to vector<16x32xf32>
      %33 = arith.addf %30, %32 : vector<16x32xf32>
      %c0_23 = arith.constant 0 : index
      %c0_24 = arith.constant 0 : index
      %34 = vector.load %arg7[%c0_23, %c0_24] : memref<16x32xf32, #tpu.memory_space<vmem>>, vector<16x32xf32>
      tpu.vector_store %arg7[%c0_23, %c0_24], %33 {strides = array<i32>} : memref<16x32xf32, #tpu.memory_space<vmem>>, vector<16x32xf32>,
    } else {
    }
    return
  }
  func.func @transform_0(%arg0: i32, %arg1: i32) -> (i32, i32) {
    %c0_i32 = arith.constant 0 : i32
    %c0_i32_0 = arith.constant 0 : i32
    return %arg0, %c0_i32 : i32, i32
  }
  func.func @transform_1(%arg0: i32, %arg1: i32) -> (i32, i32) {
    %c0_i32 = arith.constant 0 : i32
    %c0_i32_0 = arith.constant 0 : i32
    return %c0_i32, %arg1 : i32, i32
  }
  func.func @transform_2(%arg0: i32, %arg1: i32) -> (i32, i32) {
    %c0_i32 = arith.constant 0 : i32
    %c0_i32_0 = arith.constant 0 : i32
    return %c0_i32, %arg1 : i32, i32
  }
  func.func @transform_3(%arg0: i32, %arg1: i32) -> (i32, i32) {
    %c0_i32 = arith.constant 0 : i32
    %c0_i32_0 = arith.constant 0 : i32
    return %arg1, %c0_i32 : i32, i32
  }
  func.func @transform_4(%arg0: i32, %arg1: i32) -> (i32, i32) {
    %c0_i32 = arith.constant 0 : i32
    %c0_i32_0 = arith.constant 0 : i32
    %c0_i32_1 = arith.constant 0 : i32
    return %c0_i32, %c0_i32_0 : i32, i32
  }
  func.func @transform_5(%arg0: i32, %arg1: i32) -> (i32, i32) {
    %c0_i32 = arith.constant 0 : i32
    %c0_i32_0 = arith.constant 0 : i32
    return %arg0, %c0_i32 : i32, i32
  }
}

</mosaic_0001>

<bundles_post_ra>
// kernel: tpu_custom_call.1
= control target key start
LH: loop header
LB: loop body
LE: loop exit
PB: predicated region body
PF: predicated region fallthrough
CT: control target
= control target key end

     0   :  { %s333_s0 = inlined_call_operand.vmem [shape: f32[16,32], index: 0, kind: input, shape index: {}]   ;;  %s334_s1 = inlined_call_operand.vmem [shape: f32[32,128], index: 1, kind: input, shape index: {}]   ;;  %s335_s2 = inlined_call_operand.vmem [shape: f32[1,128], index: 2, kind: input, shape index: {}]   ;;  %s336_s3 = inlined_call_operand.vmem [shape: f32[128,32], index: 3, kind: input, shape index: {}]   ;;  %s337_s4 = inlined_call_operand.vmem [shape: f32[1,32], index: 4, kind: input, shape index: {}]   ;;  %s338_s5 = inlined_call_operand.hbm [shape: f32[16,32], index: 5, kind: output, shape index: {}]  }
   0x1   :  { %v33_v0 = vld [vmem:[%s334_s1 + $0x18] sm:$0xff]  ;;  %v32_v1 = vld [vmem:[%s334_s1 + $0x10] sm:$0xff]  ;;  %v31_v2 = vld [vmem:[%s334_s1 + $0x8] sm:$0xff] }
   0x2   :  { %57 = vmatpush.msra.mxu0 %v33_v0  ;;  %v103_v3 = vld [vmem:[%s336_s3 + $0x78] sm:$0xff]  ;;  %v102_v4 = vld [vmem:[%s336_s3 + $0x70] sm:$0xff]  ;;  %v30_v5 = vld [vmem:[%s334_s1] sm:$0xff] }
   0x3   :  { %104 = vmatpush.msra.mxu1 %v103_v3  ;;  %v101_v6 = vld [vmem:[%s336_s3 + $0x68] sm:$0xff]  ;;  %164 = vmatpush.msra.mxu2 %v103_v3 }
   0x4   :  { %58 = vmatpush.msra.mxu0 %v32_v1 }
   0x5   :  { %10 = vsyncpa [#allocation4], 0  ;;  %vm25_vm0 = vcmask 261120   ;;  %v28_v7 = vld [vmem:[%s333_s0] sm:$0xff]  ;;  %105 = vmatpush.msra.mxu1 %v102_v4  ;;  %165 = vmatpush.msra.mxu2 %v102_v4  ;;  %v29_v9 = vld [vmem:[%s333_s0 + $0x8] sm:$0xff]  ;;  %v216_v25 = vmov 0.0  }
   0x6   :  { %59 = vmatpush.msra.mxu0 %v31_v2  ;;  %v100_v8 = vld [vmem:[%s336_s3 + $0x60] sm:$0xff]  ;;  %v99_v10 = vld [vmem:[%s336_s3 + $0x58] sm:$0xff]  ;;  %v98_v11 = vld [vmem:[%s336_s3 + $0x50] sm:$0xff]  ;;  %26 = vst.msk [vmem:[#allocation2] sm:$0xff] %vm25_vm0, %v216_v25  ;;  %s217_s11 = smov [#allocation3]   ;;  %s150_s15 = sshll.u32 %s338_s5, 4  ;;  %s151_s15 = int_to_ptr.hbm [resolvable:$true] %s150_s15 }
   0x7   :  { %106 = vmatpush.msra.mxu1 %v101_v6  ;;  %166 = vmatpush.msra.mxu2 %v101_v6  ;;  %v97_v12 = vld [vmem:[%s336_s3 + $0x48] sm:$0xff]  ;;  %v96_v13 = vld [vmem:[%s336_s3 + $0x40] sm:$0xff]  ;;  %v95_v14 = vld [vmem:[%s336_s3 + $0x38] sm:$0xff]  ;;  %27 = vst.msk [vmem:[#allocation2 + $0x8] sm:$0xff] %vm25_vm0, %v216_v25  ;;  %s148_s12 = sshll.u32 %s217_s11, 4  ;;  %s219_s16 = smov 8   ;;  %s149_s12 = int_to_ptr.vmem [resolvable:$true] %s148_s12 }
   0x8   :  { %60 = vmatpush.msra.mxu0 %v30_v5  ;;  %v94_v15 = vld [vmem:[%s336_s3 + $0x30] sm:$0xff]  ;;  %v93_v16 = vld [vmem:[%s336_s3 + $0x28] sm:$0xff]  ;;  %v92_v17 = vld [vmem:[%s336_s3 + $0x20] sm:$0xff] }
   0x9   :  { %162 = vmatmul.msk.f32.vlgmr.msra.gmra.mxu0 %vm25_vm0, %v28_v7  ;;  %107 = vmatpush.msra.mxu1 %v100_v8  ;;  %v91_v18 = vld [vmem:[%s336_s3 + $0x18] sm:$0xff]  ;;  %v90_v19 = vld [vmem:[%s336_s3 + $0x10] sm:$0xff]  ;;  %v89_v20 = vld [vmem:[%s336_s3 + $0x8] sm:$0xff] }
   0xa   :  { %167 = vmatpush.msra.mxu2 %v100_v8  ;;  %v88_v21 = vld [vmem:[%s336_s3] sm:$0xff] }
   0xb   :  { %108 = vmatpush.msra.mxu1 %v99_v10  ;;  %v184_v22 = vld [vmem:[%s335_s2] ss:$0 sm:$0xff] }
   0xc   :  { %168 = vmatpush.msra.mxu2 %v99_v10  ;;  %v185_v49 = vld [vmem:[%s337_s4] ss:$0 sm:$0xff]  ;;  %s218_s4 = smov 128  }
   0xd   :  { %109 = vmatpush.msra.mxu1 %v98_v11  ;;  %v86_v46 = vld [vmem:[#allocation2] sm:$0xff] }
   0xe   :  { %169 = vmatpush.msra.mxu2 %v98_v11  ;;  %v87_v52 = vld [vmem:[#allocation2 + $0x8] sm:$0xff] }
   0xf   :  { %110 = vmatpush.msra.mxu1 %v97_v12 }
  0x10   :  { %170 = vmatpush.msra.mxu2 %v97_v12 }
  0x11   :  { %163 = vmatmul.msk.f32.gmra.mxu0 %vm25_vm0, %v29_v9  ;;  %111 = vmatpush.msra.mxu1 %v96_v13 }
  0x12   :  { %171 = vmatpush.msra.mxu2 %v96_v13 }
  0x13   :  { %112 = vmatpush.msra.mxu1 %v95_v14 }
  0x14   :  { %172 = vmatpush.msra.mxu2 %v95_v14 }
  0x15   :  { %113 = vmatpush.msra.mxu1 %v94_v15 }
  0x16   :  { %173 = vmatpush.msra.mxu2 %v94_v15 }
  0x17   :  { %114 = vmatpush.msra.mxu1 %v93_v16 }
  0x18   :  { %174 = vmatpush.msra.mxu2 %v93_v16 }
  0x19   :  { %115 = vmatpush.msra.mxu1 %v92_v17 }
  0x1a   :  { %175 = vmatpush.msra.mxu2 %v92_v17 }
  0x1b   :  { %116 = vmatpush.msra.mxu1 %v91_v18 }
  0x1c   :  { %176 = vmatpush.msra.mxu2 %v91_v18 }
  0x1d   :  { %117 = vmatpush.msra.mxu1 %v90_v19 }
  0x1e   :  { %177 = vmatpush.msra.mxu2 %v90_v19 }
  0x1f   :  { %118 = vmatpush.msra.mxu1 %v89_v20 }
  0x20   :  { %178 = vmatpush.msra.mxu2 %v89_v20 }
  0x21   :  { %119 = vmatpush.msra.mxu1 %v88_v21 }
  0x22   :  { %179 = vmatpush.msra.mxu2 %v88_v21 }
  0x86   :  { %v62_v23 = vpop.f32.mrf.mxu0 }
  0x87   :  { %v63_v24 = vadd.f32 %v184_v22, %v62_v23 }
  0x89   :  { %v70_v26 = vmul.f32 0.044715, %v63_v24  ;;  %v68_v39 = vmul.f32 0.5, %v63_v24 }
  0x8b   :  { %v72_v27 = vmul.f32 %v70_v26, %v63_v24 }
  0x8d   :  { %v74_v28 = vmul.f32 %v72_v27, %v63_v24 }
  0x8e   :  { %v65_v29 = vpop.f32.mrf.mxu0 }
  0x8f   :  { %v66_v30 = vadd.f32 %v184_v22, %v65_v29  ;;  %v76_v31 = vadd.f32 %v74_v28, %v63_v24 }
  0x91   :  { %v78_v32 = vmul.f32 0.7978846, %v76_v31  ;;  %v71_v33 = vmul.f32 0.044715, %v66_v30  ;;  %v69_v43 = vmul.f32 0.5, %v66_v30 }
  0x93   :  { %186 = vtanh.f32 %v78_v32  ;;  %v73_v34 = vmul.f32 %v71_v33, %v66_v30 }
  0x95   :  { %v75_v35 = vmul.f32 %v73_v34, %v66_v30 }
  0x97   :  { %v77_v36 = vadd.f32 %v75_v35, %v66_v30 }
  0x99   :  { %v187_v37 = vpop.eup %186  ;;  %v79_v38 = vmul.f32 0.7978846, %v77_v36 }
  0x9a   :  { %v82_v40 = vadd.f32 1.0, %v187_v37 }
  0x9b   :  { %188 = vtanh.f32 %v79_v38 }
  0x9c   :  { %v84_v41 = vmul.f32 %v82_v40, %v68_v39 }
  0x9e   :  { %120 = vmatmul.f32.vlgmr.msra.gmra.mxu1 %v84_v41 }
  0xa1   :  { %v189_v42 = vpop.eup %188 }
  0xa2   :  { %v83_v44 = vadd.f32 1.0, %v189_v42 }
  0xa4   :  { %v85_v45 = vmul.f32 %v83_v44, %v69_v43 }
  0xa6   :  { %123 = vmatmul.f32.vlgmr.msra.gmra.mxu2 %v85_v45 }
 0x11b   :  { %v121_v47 = vpop.f32.mrf.mxu1 }
 0x11c   :  { %v127_v48 = vadd.f32 %v121_v47, %v86_v46 }
 0x11e   :  { %129 = vst.msk [vmem:[#allocation2] sm:$0xff] %vm25_vm0, %v127_v48 }
 0x125   :  { %v134_v50 = vld [vmem:[#allocation2] sm:$0xff] }
 0x126   :  { %v140_v51 = vadd.f32 %v185_v49, %v134_v50 }
 0x128   :  { %142 = vst.msk [vmem:[#allocation3] sm:$0xff] %vm25_vm0, %v140_v51 }
 0x129   :  { %v124_v53 = vpop.f32.mrf.mxu2 }
 0x12a   :  { %v128_v54 = vadd.f32 %v124_v53, %v87_v52 }
 0x12c   :  { %130 = vst.msk [vmem:[#allocation2 + $0x8] sm:$0xff] %vm25_vm0, %v128_v54 }
 0x133   :  { %v135_v55 = vld [vmem:[#allocation2 + $0x8] sm:$0xff] }
 0x134   :  { %v141_v56 = vadd.f32 %v185_v49, %v135_v55 }
 0x136   :  { %143 = vst.msk [vmem:[#allocation3 + $0x8] sm:$0xff] %vm25_vm0, %v141_v56 }
 0x137   :  { %156 = dma.vmem_to_hbm [thread:$0]  %s149_s12, 256, %s151_s15, [#allocation4], %s218_s4, %s218_s4, %s219_s16  }
 0x138   :  { %214 = dma.done.wait [#allocation4], 256  }
 0x139   :  { %215 = vsyncadd [#allocation4], 4294967040 }
 0x13a   :  { %161 = vsyncpa [#allocation4], 1 }

</bundles_post_ra>
